<compile_context>
chip_gen: v5e
topology: v5e:2x2
jax: 0.10.0
libtpu: 0.0.40
codegen_flags: <defaults>
</compile_context>

<pallas_src>
import jax
import jax.numpy as jnp
from jax.experimental import pallas as pl
from jax.experimental.pallas import tpu as pltpu


# ---------------------------------------------------------------------------
# Generic dense (matmul + bias) Pallas kernel with an optional row-tiled
# parallel grid.  Callers pass bf16 x/w for the fast MXU path; accum is f32.
# ---------------------------------------------------------------------------
def dense_pallas(x, w, b):
    N, Cin = x.shape
    Cout = w.shape[1]

    def kernel(x_ref, w_ref, b_ref, o_ref):
        o_ref[...] = (jnp.dot(x_ref[...], w_ref[...],
                              preferred_element_type=jnp.float32)
                      + b_ref[...])

    tile = None
    for cand in (512, 256, 128, 64, 32, 16, 8):
        if N % cand == 0 and cand < N:
            tile = cand
            break
    if tile is None:
        return pl.pallas_call(
            kernel,
            out_shape=jax.ShapeDtypeStruct((N, Cout), jnp.float32),
        )(x, w, b)

    return pl.pallas_call(
        kernel,
        grid=(N // tile,),
        in_specs=[pl.BlockSpec((tile, Cin), lambda i: (i, 0)),
                  pl.BlockSpec((Cin, Cout), lambda i: (0, 0)),
                  pl.BlockSpec((1, Cout), lambda i: (0, 0))],
        out_specs=pl.BlockSpec((tile, Cout), lambda i: (i, 0)),
        out_shape=jax.ShapeDtypeStruct((N, Cout), jnp.float32),
        compiler_params=pltpu.CompilerParams(
            dimension_semantics=("parallel",)),
    )(x, w, b)


# ---------------------------------------------------------------------------
# Fused encoder: 1x1-conv projection + ReLU + 2x2 avg-pool + ctx_key 1x1 conv.
# Coarse strips of RH pooled rows per grid step; the pool is a small MXU
# matmul, so the full-resolution feature map never leaves VMEM.
# TODO(synk): the DenseNet block structure is not provided; this is a
# simplified projection+pool stand-in encoder.
# ---------------------------------------------------------------------------
def encoder_pallas(x_nhwc, pool_mat, W_enc_bf16, b_enc, W_key_bf16, b_key,
                   D, n, RH):
    B, H, Wd, Cin = x_nhwc.shape
    Hp, Wp = H // 2, Wd // 2

    def kernel(x_ref, p_ref, we_ref, be_ref, wk_ref, bk_ref, ctx_ref, key_ref):
        xt = x_ref[0].reshape(2 * RH * Wd, Cin).astype(jnp.bfloat16)
        y = jnp.dot(xt, we_ref[...], preferred_element_type=jnp.float32)
        y = jnp.maximum(y + be_ref[...], 0.0)                    # (2*RH*Wd, D)
        pooled = jnp.dot(p_ref[...], y,
                         preferred_element_type=jnp.float32)     # (RH*Wp, D)
        ctx_ref[0] = pooled.reshape(RH, Wp, D).astype(jnp.bfloat16)
        key = jnp.dot(pooled.astype(jnp.bfloat16), wk_ref[...],
                      preferred_element_type=jnp.float32) + bk_ref[...]
        key_ref[0] = key.reshape(RH, Wp, n).astype(jnp.bfloat16)

    return pl.pallas_call(
        kernel,
        grid=(B, Hp // RH),
        in_specs=[
            pl.BlockSpec((1, 2 * RH, Wd, Cin), lambda b, g: (b, g, 0, 0)),
            pl.BlockSpec((RH * Wp, 2 * RH * Wd), lambda b, g: (0, 0)),
            pl.BlockSpec((Cin, D), lambda b, g: (0, 0)),
            pl.BlockSpec((1, D), lambda b, g: (0, 0)),
            pl.BlockSpec((D, n), lambda b, g: (0, 0)),
            pl.BlockSpec((1, n), lambda b, g: (0, 0)),
        ],
        out_specs=(pl.BlockSpec((1, RH, Wp, D), lambda b, g: (b, g, 0, 0)),
                   pl.BlockSpec((1, RH, Wp, n), lambda b, g: (b, g, 0, 0))),
        out_shape=(jax.ShapeDtypeStruct((B, Hp, Wp, D), jnp.bfloat16),
                   jax.ShapeDtypeStruct((B, Hp, Wp, n), jnp.bfloat16)),
        compiler_params=pltpu.CompilerParams(
            dimension_semantics=("parallel", "parallel")),
    )(x_nhwc, pool_mat, W_enc_bf16, b_enc, W_key_bf16, b_key)


# ---------------------------------------------------------------------------
# Masked spatial mean of ctx + init_context linear + tanh (one kernel).
# Exact division (matches the torch reference, including divide-by-zero).
# ---------------------------------------------------------------------------
def init_state_pallas(ctx_flat, mask_ss, w_init, b_init):
    B, S, D = ctx_flat.shape
    n = w_init.shape[1]

    def kernel(ctx_ref, mask_ref, w_ref, b_ref, o_ref):
        mask = mask_ref[...]                                   # (B, S, 1)
        msum = jnp.sum(mask, axis=1)                           # (B, 1)
        csum = jnp.sum(ctx_ref[...] * mask, axis=1)            # (B, D) f32
        cmean = csum / msum                                    # exact divide
        o_ref[...] = jnp.tanh(
            jnp.dot(cmean, w_ref[...], preferred_element_type=jnp.float32)
            + b_ref[...])

    return pl.pallas_call(
        kernel,
        out_shape=jax.ShapeDtypeStruct((B, n), jnp.float32),
    )(ctx_flat, mask_ss, w_init, b_init)


# ---------------------------------------------------------------------------
# Decoder: GRU + coverage attention + fused heads.  Time-chunked grid; the
# recurrent state (ht, attention_past) lives in VMEM scratch across chunks.
# TODO(synk): the original Decoder class is not provided; this is a minimal
# GRU/coverage-attention stand-in with the same output shapes & dtypes (the
# attention query uses the pre-update hidden state so it fuses with Wgru_h).
# ---------------------------------------------------------------------------
def make_decoder_kernel(K, R):
    def kernel(gx_ref, headx_ref, ym_ref, init_ref, ctx_ref, key_ref,
               cmask_ref, wghq_ref, wcov_ref, vatt_ref, whead_ref,
               o_ref, ht_sc, att_sc):
        n = init_ref.shape[1]
        B, S, D = ctx_ref.shape
        Tc = gx_ref.shape[0]
        OUTW = whead_ref.shape[1]

        @pl.when(pl.program_id(0) == 0)
        def _():
            ht_sc[...] = init_ref[...]
            att_sc[...] = jnp.zeros_like(att_sc)

        cmask = cmask_ref[...]                                 # (B, S, 1)
        wcov_bf = wcov_ref[...].astype(jnp.bfloat16)           # (1, 1, n)

        def step(t, carry):
            gx = gx_ref[t]                                     # (B, 3n)
            ym = ym_ref[t]                                     # (B, 1)
            h = ht_sc[...]                                     # (B, n)

            # --- fused h projection: [Wgru_h | W_att_q] -> one matmul/step --
            ghq = jnp.dot(h, wghq_ref[...],
                          preferred_element_type=jnp.float32)  # (B, 4n)
            z = jax.nn.sigmoid(gx[:, :n] + ghq[:, :n])
            r = jax.nn.sigmoid(gx[:, n:2 * n] + ghq[:, n:2 * n])
            hc = jnp.tanh(gx[:, 2 * n:3 * n] + r * ghq[:, 2 * n:3 * n])
            h_new = (1.0 - z) * h + z * hc
            h = ym * h_new + (1.0 - ym) * h

            # --- coverage attention in (B,S,n) layout; energy math in bf16,
            #     softmax stats in f32 (keys stored bf16 -> half VMEM/DMA) ---
            q = ghq[:, 3 * n:4 * n]                            # (B, n)
            att = att_sc[...]                                  # (B, S, 1)
            e = jnp.tanh(q.astype(jnp.bfloat16)[:, None, :]
                         + key_ref[...]
                         + att.astype(jnp.bfloat16) * wcov_bf)  # (B, S, n)
            score = jnp.dot(e.reshape(B * S, n), vatt_ref[...],
                            preferred_element_type=jnp.float32
                            ).reshape(B, S, 1)
            score = jnp.where(cmask > 0, score,
                              jnp.full_like(score, -1e9))
            score = score - jnp.max(score, axis=1, keepdims=True)
            ex = jnp.exp(score) * cmask
            denom = jnp.sum(ex, axis=1, keepdims=True) + 1e-8
            alpha = ex * pl.reciprocal(denom, approx=True)     # (B, S, 1)
            ct = jnp.sum(ctx_ref[...] * alpha, axis=1)         # (B, D) f32

            att_sc[...] = att + alpha
            ht_sc[...] = h

            # --- fused heads: one (B, D+n) x (D+n, OUTW) matmul per step ----
            #   columns [0,K)       : object logits
            #   columns [K,K+R)     : relation logits
            #   columns [K+R,2K+R)  : pixel log-probabilities (log-softmax)
            feat = jnp.concatenate([ct, h], axis=1)
            slab = (jnp.dot(feat, whead_ref[...],
                            preferred_element_type=jnp.float32)
                    + headx_ref[t])
            lane = jax.lax.broadcasted_iota(jnp.int32, (B, OUTW), 1)
            pmask = jnp.logical_and(lane >= K + R, lane < 2 * K + R)
            mx = jnp.max(jnp.where(pmask, slab, jnp.full_like(slab, -1e30)),
                         axis=1, keepdims=True)
            exs = jnp.where(pmask, jnp.exp(slab - mx), jnp.zeros_like(slab))
            lse = mx + jnp.log(jnp.sum(exs, axis=1, keepdims=True))
            o_ref[t] = jnp.where(pmask, slab - lse, slab)
            return carry

        jax.lax.fori_loop(0, Tc, step, 0)
    return kernel


def decoder_pallas(gx, headx, ymask, init_state, ctx, ctx_key, cmask_ss,
                   W_ghq, wcov, v_att, W_head, K, R, Tc, single_buffer):
    T_pad, B, G = gx.shape
    S, D = ctx.shape[1], ctx.shape[2]
    n = init_state.shape[1]
    OUTW = W_head.shape[1]
    nc = T_pad // Tc

    invariants = (init_state, ctx, ctx_key, cmask_ss, W_ghq, wcov, v_att,
                  W_head)

    def inv_spec(arr):
        nd = arr.ndim
        if single_buffer:
            return pl.BlockSpec(arr.shape, lambda c, _nd=nd: (0,) * _nd,
                                pipeline_mode=pl.Buffered(1))
        return pl.BlockSpec(arr.shape, lambda c, _nd=nd: (0,) * _nd)

    in_specs = [
        pl.BlockSpec((Tc, B, G), lambda c: (c, 0, 0)),        # gx stream
        pl.BlockSpec((Tc, B, OUTW), lambda c: (c, 0, 0)),     # headx stream
        pl.BlockSpec((Tc, B, 1), lambda c: (c, 0, 0)),        # y_mask stream
    ] + [inv_spec(a) for a in invariants]

    # vmem budget sized from the actual residents, capped for v7x (64 MiB).
    def nbytes(a):
        return int(a.size) * a.dtype.itemsize
    stream = 2 * Tc * B * (G + OUTW + 1) * 4 + 2 * Tc * B * OUTW * 4
    resident = sum(nbytes(a) for a in invariants)
    if not single_buffer:
        resident *= 2
    scratch = (B * n + B * S) * 4
    vmem_limit = int(min(max(2 * (stream + resident + scratch) + (1 << 20),
                             32 * 1024 * 1024), 64 * 1024 * 1024))

    return pl.pallas_call(
        make_decoder_kernel(K, R),
        grid=(nc,),
        in_specs=in_specs,
        out_specs=pl.BlockSpec((Tc, B, OUTW), lambda c: (c, 0, 0)),
        out_shape=jax.ShapeDtypeStruct((T_pad, B, OUTW), jnp.float32),
        scratch_shapes=[
            pltpu.VMEM((B, n), jnp.float32),       # ht
            pltpu.VMEM((B, S, 1), jnp.float32),    # attention_past
        ],
        compiler_params=pltpu.CompilerParams(
            dimension_semantics=("arbitrary",),
            vmem_limit_bytes=vmem_limit),
    )(gx, headx, ymask, *invariants)
    # TODO(synk): on v7x add a leading "parallel" grid axis that splits the
    # batch across the two TensorCores (needs B divisible by 2*8 sublanes).


# ---------------------------------------------------------------------------
# Masked losses, streamed over the time axis with accumulator scratch:
#   object_loss     : CrossEntropy(reduction='none') + y_mask weighting
#   object_pix_loss : NLLLoss(reduction='none')      + y_mask weighting
#   relation_loss   : BCEWithLogits(reduction='none')+ re_mask weighting
#   total = lc*object + lr*relation + lp*pix          (exact division)
# The full lane-dense prediction slab is passed in and split in-kernel.
# ---------------------------------------------------------------------------
def make_loss_kernel(K, R, lc_lambda, lr_lambda, lc_lambda_pix):
    def kernel(pred_ref, cy_ref, cre_ref, ym_ref, rem_ref, out_ref,
               ce_acc, nll_acc, bce_acc, ym_acc, rem_acc):
        @pl.when(pl.program_id(0) == 0)
        def _():
            ce_acc[...] = jnp.zeros_like(ce_acc)
            nll_acc[...] = jnp.zeros_like(nll_acc)
            bce_acc[...] = jnp.zeros_like(bce_acc)
            ym_acc[...] = jnp.zeros_like(ym_acc)
            rem_acc[...] = jnp.zeros_like(rem_acc)

        slab = pred_ref[...]                        # (Tt, B, OUTW)
        Tt, B, _ = slab.shape
        cy = cy_ref[...]                            # (Tt, B) int32
        ym = ym_ref[...]                            # (Tt, B)
        rem = rem_ref[...]                          # (Tt, B)

        obj = slab[:, :, :K]                        # logits
        rel = slab[:, :, K:K + R]                   # logits
        pix = slab[:, :, K + R:2 * K + R]           # log-probs

        iota_k = jax.lax.broadcasted_iota(jnp.int32, (Tt, B, K), 2)
        onehot = (iota_k == cy[:, :, None]).astype(jnp.float32)

        # CrossEntropy = logsumexp(logits) - logits[target]
        picked = jnp.sum(obj * onehot, axis=2)
        mx = jnp.max(obj, axis=2)
        lse = mx + jnp.log(jnp.sum(jnp.exp(obj - mx[:, :, None]), axis=2))
        ce_acc[...] += jnp.sum((lse - picked) * ym, axis=0, keepdims=True)

        # NLL = -logprob[target]
        nll = -jnp.sum(pix * onehot, axis=2)
        nll_acc[...] += jnp.sum(nll * ym, axis=0, keepdims=True)

        # BCEWithLogits = max(x,0) - x*y + log(1 + exp(-|x|))
        yr = cre_ref[...]
        bce = (jnp.maximum(rel, 0.0) - rel * yr
               + jnp.log1p(jnp.exp(-jnp.abs(rel))))
        bce_acc[...] += jnp.sum(jnp.sum(bce, axis=2) * rem, axis=0,
                                keepdims=True)

        ym_acc[...] += jnp.sum(ym, axis=0, keepdims=True)
        rem_acc[...] += jnp.sum(rem, axis=0, keepdims=True)

        @pl.when(pl.program_id(0) == pl.num_programs(0) - 1)
        def _():
            inv_B = 1.0 / B
            obj_loss = jnp.sum(ce_acc[...] / ym_acc[...],
                               axis=1, keepdims=True) * inv_B
            pix_loss = jnp.sum(nll_acc[...] / ym_acc[...],
                               axis=1, keepdims=True) * inv_B
            rel_loss = jnp.sum(bce_acc[...] / rem_acc[...],
                               axis=1, keepdims=True) * inv_B
            total = (lc_lambda * obj_loss + lr_lambda * rel_loss
                     + lc_lambda_pix * pix_loss)
            out_ref[...] = jnp.concatenate(
                [total, obj_loss, rel_loss, pix_loss], axis=1)   # (1, 4)
    return kernel


def losses_pallas(params, pred, C_y, C_re, y_mask, re_mask, K, R):
    T, B, OUTW = pred.shape
    R_ = C_re.shape[2]
    # Time tile: full T when small / non-8-divisible (blocks must be 8-aligned
    # on the sublane dim or equal the full dim), else stream in chunks of 8.
    Tt = T if (T <= 32 or T % 8 != 0) else 8
    nt = T // Tt
    kernel = make_loss_kernel(K, R, params["lc_lambda"], params["lr_lambda"],
                              params["lc_lambda_pix"])
    out = pl.pallas_call(
        kernel,
        grid=(nt,),
        in_specs=[pl.BlockSpec((Tt, B, OUTW), lambda i: (i, 0, 0)),
                  pl.BlockSpec((Tt, B), lambda i: (i, 0)),
                  pl.BlockSpec((Tt, B, R_), lambda i: (i, 0, 0)),
                  pl.BlockSpec((Tt, B), lambda i: (i, 0)),
                  pl.BlockSpec((Tt, B), lambda i: (i, 0))],
        out_specs=pl.BlockSpec((1, 4), lambda i: (0, 0)),
        out_shape=jax.ShapeDtypeStruct((1, 4), jnp.float32),
        scratch_shapes=[pltpu.VMEM((1, B), jnp.float32)] * 5,
        compiler_params=pltpu.CompilerParams(
            dimension_semantics=("arbitrary",)),
    )(pred, C_y, C_re, y_mask, re_mask)
    return out[0, 0], out[0, 1], out[0, 2]


# ---------------------------------------------------------------------------
# Full Encoder_Decoder.forward
# ---------------------------------------------------------------------------
def encoder_decoder_forward(params, weights, x, x_mask, C_y, P_y, C_re, P_re,
                            y_mask, re_mask, length):
    B, C_in, H, Wd = x.shape
    D, n, m = params["D"], params["n"], params["m"]
    K = weights["W_obj_ct"].shape[1]
    R = weights["W_rel_ct"].shape[1]

    # ---- Encoder: fused 1x1 proj + ReLU + 2x2 avg-pool + ctx_key conv ------
    x_nhwc = jnp.transpose(x, (0, 2, 3, 1))                   # (B, H, W, Cin)
    Hp, Wp = H // 2, Wd // 2
    RH = next(c for c in (16, 8, 4, 2, 1) if Hp % c == 0)     # pooled rows/step
    rows = jnp.arange(RH * Wp)
    cols = jnp.arange(2 * RH * Wd)
    pool_mat = 0.25 * (
        ((cols[None, :] // Wd) // 2 == rows[:, None] // Wp)
        & ((cols[None, :] % Wd) // 2 == rows[:, None] % Wp)
    ).astype(jnp.float32)                                     # (RH*Wp, 2*RH*Wd)
    ctx_nhwc, key_nhwc = encoder_pallas(
        x_nhwc, pool_mat,
        weights["W_enc"].astype(jnp.bfloat16), weights["b_enc"],
        weights["W_key"].astype(jnp.bfloat16), weights["b_key"], D, n, RH)
    ctx_mask = x_mask[:, ::2, ::2]                            # (B, Hp, Wp)

    S = Hp * Wp
    ctx_flat = ctx_nhwc.reshape(B, S, D)                      # bf16
    key_flat = key_nhwc.reshape(B, S, n)                      # bf16, no transpose
    cmask_ss = ctx_mask.reshape(B, S, 1).astype(jnp.float32)  # (B, S, 1)

    # ---- init_context: masked mean + tanh(Linear(D->n)) --------------------
    init_state = init_state_pallas(ctx_flat, cmask_ss,
                                   weights["W_init"], weights["b_init"])

    # ---- hoisted time-invariant projections (single bf16 MXU matmuls) ------
    T = length
    xemb = weights["Emb_y"][P_y] + weights["Emb_re"][P_re]    # (T, B, m) glue
    xemb_bf = xemb.reshape(T * B, m).astype(jnp.bfloat16)
    gx = dense_pallas(xemb_bf, weights["Wgru_x"].astype(jnp.bfloat16),
                      weights["b_gru"]).reshape(T, B, 3 * n)

    OUTW = ((2 * K + R + 127) // 128) * 128                   # lane-dense slab

    def zpad(w):
        return jnp.concatenate(
            [w, jnp.zeros((w.shape[0], OUTW - w.shape[1]), jnp.float32)],
            axis=1)
    W_head_ct = zpad(jnp.concatenate(
        [weights["W_obj_ct"], weights["W_rel_ct"], weights["W_pix"]], axis=1))
    W_head_h = zpad(jnp.concatenate(
        [weights["W_obj_h"], weights["W_rel_h"],
         jnp.zeros((n, K), jnp.float32)], axis=1))
    W_head = jnp.concatenate([W_head_ct, W_head_h], axis=0)   # (D+n, OUTW)
    W_head_x = zpad(jnp.concatenate(
        [weights["W_obj_x"], jnp.zeros((m, R + K), jnp.float32)], axis=1))
    b_head = zpad(jnp.concatenate(
        [weights["b_obj"], weights["b_rel"], weights["b_pix"]], axis=1))
    headx = dense_pallas(xemb_bf, W_head_x.astype(jnp.bfloat16),
                         b_head).reshape(T, B, OUTW)

    W_ghq = jnp.concatenate([weights["Wgru_h"], weights["W_att_q"]], axis=1)
    wcov = weights["w_att_cov"].reshape(1, 1, n)              # per-channel cov
    v_att = weights["v_att"].reshape(n, 1).astype(jnp.bfloat16)
    ymask3 = y_mask[:, :, None]                               # (T, B, 1)

    # ---- decoder: time-chunked grid, recurrent state in VMEM scratch -------
    Tc = min(T, 16)
    T_pad = ((T + Tc - 1) // Tc) * Tc
    if T_pad != T:                                            # zero-pad tail
        pad = ((0, T_pad - T), (0, 0), (0, 0))
        gx_p = jnp.pad(gx, pad)
        headx_p = jnp.pad(headx, pad)
        ym_p = jnp.pad(ymask3, pad)
    else:
        gx_p, headx_p, ym_p = gx, headx, ymask3

    dec_args = (gx_p, headx_p, ym_p, init_state, ctx_flat, key_flat, cmask_ss,
                W_ghq, wcov, v_att, W_head, K, R, Tc)
    try:
        pred = decoder_pallas(*dec_args, single_buffer=True)
    except Exception:
        # TODO(synk): pl.Buffered(1) not supported on this jax build; fall
        # back to default double-buffered invariant blocks.
        pred = decoder_pallas(*dec_args, single_buffer=False)
    pred = pred[:T]                      # drop time padding (leading-dim slice)

    # ---- masked losses (full lane-dense slab; split inside the kernel) -----
    return losses_pallas(params, pred, C_y, C_re, y_mask, re_mask, K, R)


# ---------------------------------------------------------------------------
# Deterministic parameter construction.
# ---------------------------------------------------------------------------
def build_weights(key, C_in, D, n, m, K, R):
    keys = jax.random.split(key, 24)
    g = lambda i, shape, s=0.1: (s * jax.random.normal(keys[i], shape)
                                 ).astype(jnp.float32)
    return {
        "W_enc": g(0, (C_in, D)), "b_enc": jnp.zeros((1, D), jnp.float32),
        "W_init": g(1, (D, n)), "b_init": jnp.zeros((1, n), jnp.float32),
        "W_key": g(2, (D, n)), "b_key": jnp.zeros((1, n), jnp.float32),
        "Emb_y": g(3, (K, m)), "Emb_re": g(4, (10, m)),
        "Wgru_x": g(5, (m, 3 * n)), "Wgru_h": g(6, (n, 3 * n)),
        "b_gru": jnp.zeros((1, 3 * n), jnp.float32),
        "W_att_q": g(7, (n, n)), "w_att_cov": g(8, (1, n, 1)),
        "v_att": g(9, (1, n)),
        "W_obj_ct": g(10, (D, K)), "W_obj_h": g(11, (n, K)),
        "W_obj_x": g(12, (m, K)), "b_obj": jnp.zeros((1, K), jnp.float32),
        "W_rel_ct": g(13, (D, R)), "W_rel_h": g(14, (n, R)),
        "b_rel": jnp.zeros((1, R), jnp.float32),
        "W_pix": g(15, (D, K)), "b_pix": jnp.zeros((1, K), jnp.float32),
    }


if __name__ == "__main__":
    # small, shape-consistent synthetic problem
    B, C_in, H, Wd = 2, 4, 16, 16
    T, K, R = 6, 12, 9
    params = {
        "growthRate": 4, "reduction": 0.5, "bottleneck": True,
        "use_dropout": False,                       # unused by the stand-in
        "D": 32, "n": 32, "m": 32,
        "lc_lambda": 1.0, "lr_lambda": 1.0, "lc_lambda_pix": 0.5,
    }

    key = jax.random.PRNGKey(0)
    kx, kcy, kpy, kpre, kcre, kw = jax.random.split(key, 6)

    x = jax.random.normal(kx, (B, C_in, H, Wd), jnp.float32)
    x_mask = jnp.ones((B, H, Wd), jnp.float32).at[1, :, 12:].set(0.0)
    C_y = jax.random.randint(kcy, (T, B), 0, K).astype(jnp.int32)
    P_y = jax.random.randint(kpy, (T, B), 0, K).astype(jnp.int32)
    P_re = jax.random.randint(kpre, (T, B), 0, 10).astype(jnp.int32)
    C_re = (jax.random.uniform(kcre, (T, B, R)) < 0.3).astype(jnp.float32)
    y_mask = jnp.ones((T, B), jnp.float32).at[T - 1, 1].set(0.0)
    re_mask = jnp.ones((T, B), jnp.float32).at[T - 1, 1].set(0.0)

    weights = build_weights(kw, C_in, params["D"], params["n"], params["m"],
                            K, R)

    loss, object_loss, relation_loss = encoder_decoder_forward(
        params, weights, x, x_mask, C_y, P_y, C_re, P_re, y_mask, re_mask, T)
    jax.block_until_ready((loss, object_loss, relation_loss))
    print("KERNEL_OK")
</pallas_src>

<mosaic_0001>
module attributes {stable_mosaic.version = 11 : i64} {
  func.func @kernel(%arg0: i32, %arg1: i32, %arg2: memref<1x16x16x4xf32, #tpu.memory_space<vmem>>, %arg3: memref<64x256xf32, #tpu.memory_space<vmem>>, %arg4: memref<4x32xbf16, #tpu.memory_space<vmem>>, %arg5: memref<1x32xf32, #tpu.memory_space<vmem>>, %arg6: memref<32x32xbf16, #tpu.memory_space<vmem>>, %arg7: memref<1x32xf32, #tpu.memory_space<vmem>>, %arg8: memref<1x8x8x32xbf16, #tpu.memory_space<vmem>>, %arg9: memref<1x8x8x32xbf16, #tpu.memory_space<vmem>>) attributes {dimension_semantics = [#tpu.dimension_semantics<parallel>, #tpu.dimension_semantics<parallel>], iteration_bounds = array<i64: 2, 1>, scalar_prefetch = 0 : i64, scratch_operands = 0 : i64, tpu.core_type = #tpu.core_type<tc>, window_params = [{transform_indices = @transform_0, window_bounds = array<i64: 1, 16, 16, 4>}, {pipeline_mode = #tpu.pipeline_mode<synchronous>, transform_indices = @transform_1, window_bounds = array<i64: 64, 256>}, {pipeline_mode = #tpu.pipeline_mode<synchronous>, transform_indices = @transform_2, window_bounds = array<i64: 4, 32>}, {pipeline_mode = #tpu.pipeline_mode<synchronous>, transform_indices = @transform_3, window_bounds = array<i64: 1, 32>}, {pipeline_mode = #tpu.pipeline_mode<synchronous>, transform_indices = @transform_4, window_bounds = array<i64: 32, 32>}, {pipeline_mode = #tpu.pipeline_mode<synchronous>, transform_indices = @transform_5, window_bounds = array<i64: 1, 32>}, {transform_indices = @transform_6, window_bounds = array<i64: 1, 8, 8, 32>}, {transform_indices = @transform_7, window_bounds = array<i64: 1, 8, 8, 32>}]} {
    %c0 = arith.constant 0 : index
    %c0_0 = arith.constant 0 : index
    %c0_1 = arith.constant 0 : index
    %c0_2 = arith.constant 0 : index
    %0 = vector.load %arg2[%c0, %c0_0, %c0_1, %c0_2] : memref<1x16x16x4xf32, #tpu.memory_space<vmem>>, vector<1x16x16x4xf32>
    %1 = vector.shape_cast %0 : vector<1x16x16x4xf32> to vector<16x16x4xf32>
    %2 = vector.shape_cast %1 : vector<16x16x4xf32> to vector<256x4xf32>
    %3 = arith.truncf %2 : vector<256x4xf32> to vector<256x4xbf16>
    %c0_3 = arith.constant 0 : index
    %c0_4 = arith.constant 0 : index
    %4 = vector.load %arg4[%c0_3, %c0_4] : memref<4x32xbf16, #tpu.memory_space<vmem>>, vector<4x32xbf16>
    %cst = arith.constant dense<0.000000e+00> : vector<256x32xf32>
    %5 = tpu.matmul %3, %4, %cst {dimension_numbers = #tpu.dot_dimension_numbers<[1], [0], [0], [1], [0, 0, 1, 1], [], []>} : vector<256x4xbf16>, vector<4x32xbf16>, vector<256x32xf32> -> vector<256x32xf32>
    %c0_5 = arith.constant 0 : index
    %c0_6 = arith.constant 0 : index
    %6 = vector.load %arg5[%c0_5, %c0_6] : memref<1x32xf32, #tpu.memory_space<vmem>>, vector<1x32xf32>
    %7 = vector.broadcast %6 : vector<1x32xf32> to vector<256x32xf32>
    %8 = arith.addf %5, %7 : vector<256x32xf32>
    %cst_7 = arith.constant 0.000000e+00 : f32
    %9 = vector.broadcast %cst_7 : f32 to vector<256x32xf32>
    %10 = arith.maximumf %8, %9 : vector<256x32xf32>
    %c0_8 = arith.constant 0 : index
    %c0_9 = arith.constant 0 : index
    %11 = vector.load %arg3[%c0_8, %c0_9] : memref<64x256xf32, #tpu.memory_space<vmem>>, vector<64x256xf32>
    %cst_10 = arith.constant dense<0.000000e+00> : vector<64x32xf32>
    %12 = tpu.matmul %11, %10, %cst_10 {dimension_numbers = #tpu.dot_dimension_numbers<[1], [0], [0], [1], [0, 0, 1, 1], [], []>} : vector<64x256xf32>, vector<256x32xf32>, vector<64x32xf32> -> vector<64x32xf32>
    %13 = vector.shape_cast %12 : vector<64x32xf32> to vector<8x8x32xf32>
    %14 = arith.truncf %13 : vector<8x8x32xf32> to vector<8x8x32xbf16>
    %c0_11 = arith.constant 0 : index
    %c0_12 = arith.constant 0 : index
    %c0_13 = arith.constant 0 : index
    %c0_14 = arith.constant 0 : index
    %15 = vector.load %arg8[%c0_11, %c0_12, %c0_13, %c0_14] : memref<1x8x8x32xbf16, #tpu.memory_space<vmem>>, vector<1x8x8x32xbf16>
    %16 = vector.shape_cast %15 : vector<1x8x8x32xbf16> to vector<8x8x32xbf16>
    %17 = vector.shape_cast %14 : vector<8x8x32xbf16> to vector<1x8x8x32xbf16>
    tpu.vector_store %arg8[%c0_11, %c0_12, %c0_13, %c0_14], %17 {strides = array<i32>} : memref<1x8x8x32xbf16, #tpu.memory_space<vmem>>, vector<1x8x8x32xbf16>,
    %18 = arith.truncf %12 : vector<64x32xf32> to vector<64x32xbf16>
    %c0_15 = arith.constant 0 : index
    %c0_16 = arith.constant 0 : index
    %19 = vector.load %arg6[%c0_15, %c0_16] : memref<32x32xbf16, #tpu.memory_space<vmem>>, vector<32x32xbf16>
    %cst_17 = arith.constant dense<0.000000e+00> : vector<64x32xf32>
    %20 = tpu.matmul %18, %19, %cst_17 {dimension_numbers = #tpu.dot_dimension_numbers<[1], [0], [0], [1], [0, 0, 1, 1], [], []>} : vector<64x32xbf16>, vector<32x32xbf16>, vector<64x32xf32> -> vector<64x32xf32>
    %c0_18 = arith.constant 0 : index
    %c0_19 = arith.constant 0 : index
    %21 = vector.load %arg7[%c0_18, %c0_19] : memref<1x32xf32, #tpu.memory_space<vmem>>, vector<1x32xf32>
    %22 = vector.broadcast %21 : vector<1x32xf32> to vector<64x32xf32>
    %23 = arith.addf %20, %22 : vector<64x32xf32>
    %24 = vector.shape_cast %23 : vector<64x32xf32> to vector<8x8x32xf32>
    %25 = arith.truncf %24 : vector<8x8x32xf32> to vector<8x8x32xbf16>
    %c0_20 = arith.constant 0 : index
    %c0_21 = arith.constant 0 : index
    %c0_22 = arith.constant 0 : index
    %c0_23 = arith.constant 0 : index
    %26 = vector.load %arg9[%c0_20, %c0_21, %c0_22, %c0_23] : memref<1x8x8x32xbf16, #tpu.memory_space<vmem>>, vector<1x8x8x32xbf16>
    %27 = vector.shape_cast %26 : vector<1x8x8x32xbf16> to vector<8x8x32xbf16>
    %28 = vector.shape_cast %25 : vector<8x8x32xbf16> to vector<1x8x8x32xbf16>
    tpu.vector_store %arg9[%c0_20, %c0_21, %c0_22, %c0_23], %28 {strides = array<i32>} : memref<1x8x8x32xbf16, #tpu.memory_space<vmem>>, vector<1x8x8x32xbf16>,
    return
  }
  func.func @transform_0(%arg0: i32, %arg1: i32) -> (i32, i32, i32, i32) {
    %c0_i32 = arith.constant 0 : i32
    %c0_i32_0 = arith.constant 0 : i32
    %c0_i32_1 = arith.constant 0 : i32
    return %arg0, %arg1, %c0_i32, %c0_i32_0 : i32, i32, i32, i32
  }
  func.func @transform_1(%arg0: i32, %arg1: i32) -> (i32, i32) {
    %c0_i32 = arith.constant 0 : i32
    %c0_i32_0 = arith.constant 0 : i32
    %c0_i32_1 = arith.constant 0 : i32
    return %c0_i32, %c0_i32_0 : i32, i32
  }
  func.func @transform_2(%arg0: i32, %arg1: i32) -> (i32, i32) {
    %c0_i32 = arith.constant 0 : i32
    %c0_i32_0 = arith.constant 0 : i32
    %c0_i32_1 = arith.constant 0 : i32
    return %c0_i32, %c0_i32_0 : i32, i32
  }
  func.func @transform_3(%arg0: i32, %arg1: i32) -> (i32, i32) {
    %c0_i32 = arith.constant 0 : i32
    %c0_i32_0 = arith.constant 0 : i32
    %c0_i32_1 = arith.constant 0 : i32
    return %c0_i32, %c0_i32_0 : i32, i32
  }
  func.func @transform_4(%arg0: i32, %arg1: i32) -> (i32, i32) {
    %c0_i32 = arith.constant 0 : i32
    %c0_i32_0 = arith.constant 0 : i32
    %c0_i32_1 = arith.constant 0 : i32
    return %c0_i32, %c0_i32_0 : i32, i32
  }
  func.func @transform_5(%arg0: i32, %arg1: i32) -> (i32, i32) {
    %c0_i32 = arith.constant 0 : i32
    %c0_i32_0 = arith.constant 0 : i32
    %c0_i32_1 = arith.constant 0 : i32
    return %c0_i32, %c0_i32_0 : i32, i32
  }
  func.func @transform_6(%arg0: i32, %arg1: i32) -> (i32, i32, i32, i32) {
    %c0_i32 = arith.constant 0 : i32
    %c0_i32_0 = arith.constant 0 : i32
    %c0_i32_1 = arith.constant 0 : i32
    return %arg0, %arg1, %c0_i32, %c0_i32_0 : i32, i32, i32, i32
  }
  func.func @transform_7(%arg0: i32, %arg1: i32) -> (i32, i32, i32, i32) {
    %c0_i32 = arith.constant 0 : i32
    %c0_i32_0 = arith.constant 0 : i32
    %c0_i32_1 = arith.constant 0 : i32
    return %arg0, %arg1, %c0_i32, %c0_i32_0 : i32, i32, i32, i32
  }
}

</mosaic_0001>

<bundles_post_ra>
// kernel: tpu_custom_call.1
= control target key start
LH: loop header
LB: loop body
LE: loop exit
PB: predicated region body
PF: predicated region fallthrough
CT: control target
= control target key end

     0   :  { %s1531_s0 = inlined_call_operand.vmem [shape: f32[2,16,16,4], index: 0, kind: input, shape index: {}]   ;;  %s1532_s1 = inlined_call_operand.vmem [shape: f32[64,256], index: 1, kind: input, shape index: {}]   ;;  %s1533_s2 = inlined_call_operand.vmem [shape: bf16[4,32], index: 2, kind: input, shape index: {}]   ;;  %s1534_s3 = inlined_call_operand.vmem [shape: f32[1,32], index: 3, kind: input, shape index: {}]   ;;  %s1535_s4 = inlined_call_operand.vmem [shape: bf16[32,32], index: 4, kind: input, shape index: {}]   ;;  %s1536_s5 = inlined_call_operand.vmem [shape: f32[1,32], index: 5, kind: input, shape index: {}]   ;;  %s1537_s6 = inlined_call_operand.hbm [shape: bf16[2,8,8,32], index: 6, kind: output, shape index: {0}]   ;;  %s1538_s7 = inlined_call_operand.hbm [shape: bf16[2,8,8,32], index: 7, kind: output, shape index: {1}]  }
   0x1   :  { %1540 = sst [smem:[#allocation8_spill]] %s1531_s0 }
   0x2   :  { %1541 = sst [smem:[#allocation9_spill]] %s1532_s1 }
   0x3   :  { %1542 = sst [smem:[#allocation10_spill]] %s1533_s2 }
   0x4   :  { %13 = vsyncpa [#allocation3], 0 }
   0x5   :  { %15 = vsyncpa [#allocation3 + $0x1], 0 }
   0x6   :  { %16 = vsyncpa [#allocation5], 0 }
   0x7   :  { %18 = vsyncpa [#allocation5 + $0x1], 0  ;;  %s1180_s24 = smov 0   ;;  %s1182_s25 = smov 0  }
   0x8   :  { %s1184_s26 = smov 0   ;;  %s1186_s27 = smov 0  }
   0x9   :  { %s1188_s28 = smov 0   ;;  %s1190_s29 = smov 0  }
   0xa LB: > { %s910_s30 = sadd.s32 4294967295, %s1136_s29   ;;  %s911_s8 = sadd.s32 4294967294, %s1136_s29   ;;  %s1136_s29 = sphi %s1190_s29, %s24_s29   ;;  %s1132_s28 = sphi %s1188_s28, %s1553_s28   ;;  %s1128_s27 = sphi %s1186_s27, %s1552_s27   ;;  %s1124_s26 = sphi %s1184_s26, %s1551_s26   ;;  %s1120_s25 = sphi %s1182_s25, %s1550_s25   ;;  %s1116_s24 = sphi %s1180_s24, %s1549_s24  }
   0xb   : > { %s36_s9 = sadd.s32 1, %s1132_s28  ;;  %s178_s10 = sadd.s32 1, %s1124_s26 }
   0xc   : > { %p38_p0 = scmp.ge.s32.totalorder %s36_s9, 2  ;;  %p188_p1 = scmp.ne.s32.totalorder %s1124_s26, %s1120_s25 }
   0xd   : > { %p189_p2 = scmp.eq.s32.totalorder %s910_s30, 1  ;;  %p194_p3 = scmp.ne.s32.totalorder %s1120_s25, %s1116_s24 }
   0xe   : > { %s1555_s9 = smov (%p38_p0, %s36_s9), 0  ;;  %p195_p5 = scmp.eq.s32.totalorder %s911_s8, 1 }
   0xf   : > { %p1220_p4 = por %p189_p2, %p188_p1  ;;  %s173_s12 = ssub.s32 %s1132_s28, %s1555_s9 }
  0x10   : > { %p914_p6 = scmp.ge.s32.totalorder %s1136_s29, 1  ;;  %p176_p7 = scmp.eq.s32.totalorder %s173_s12, 0 }
  0x11   : > { %p1227_p8 = por %p195_p5, %p194_p3  ;;  %p270_p9 = scmp.lt.s32.totalorder %s1136_s29, 3 }
  0x12   : > { %s1233_s14 = scalar_select %p176_p7, %s1124_s26, %s178_s10  }
  0x13   : > { %p271_p10 = pnand %p914_p6, %p270_p9 }
  0x14   : > { %s1545_s2 = sld [smem:[#allocation10_spill]] (!%p271_p10)  ;;  %p313_p11 = scmp.lt.s32.totalorder (!%p271_p10), %s1128_s27, 1 }
  0x15   : > { %274 = sbr.rel (%p271_p10) target bundleno = 647 (0x287), region = 44  ;;  %s1546_s0 = sld [smem:[#allocation8_spill]] (!%p271_p10) }
  0x16   : > { %s1547_s1 = sld [smem:[#allocation9_spill]] (!%p271_p10)  ;;  %s958_s30 = sshll.u32 (!%p271_p10), %s1128_s27, 5 }
  0x17   : > { %s769_s12 = scalar_lea.hbm (!%p271_p10), %s1537_s6, %s958_s30 }
  0x18   : > { %s772_s16 = sshll.u32 (!%p271_p10), %s769_s12, 4  ;;  %s773_s16 = int_to_ptr.hbm [resolvable:$true] %s772_s16 }
  0x1a   : > { %v374_v0 = vld [vmem:[%s1545_s2] sm:$0x3]  ;;  %vm428_vm0 = vcmask 1041408   ;;  %s314_s17 = scalar_select %p313_p11, %s1128_s27, 1  ;;  %vm379_vm1 = vcmask 31744   ;;  %vm659_vm2 = vcmask 257024  }
  0x1b   : > { %v430_v1 = vsel %vm428_vm0, %v374_v0, 0  ;;  %vm692_vm3 = vcmask 261120  }
  0x1c   : > { %439 = vmatpush.bf16.msra.mxu0 %v430_v1  ;;  %961 = vmatpush.bf16.msra.mxu3 %v430_v1  ;;  %s955_s18 = sshll.u32 %s314_s17, 8 }
  0x1d   : > { %960 = vmatpush.bf16.msra.mxu1 %v430_v1  ;;  %s1243_s21 = scalar_lea.vmem %s1546_s0, %s955_s18  ;;  %s1040_s18 = sshra.s32 %s773_s16, 4  ;;  %s1041_s18 = int_to_ptr.hbm [resolvable:$true] %s1040_s18 }
  0x1e   : > { %v326_v2 = vld [vmem:[%s1243_s21] sm:$0xff]  ;;  %v327_v3 = vld [vmem:[%s1243_s21 + $0x8] sm:$0xff]  ;;  %v328_v11 = vld [vmem:[%s1243_s21 + $0x10] sm:$0xff]  ;;  %s1042_s19 = scalar_lea.hbm %s1041_s18, 32  ;;  %s1046_s0 = scalar_lea.hbm %s1537_s6, 64 }
  0x1f   : > { %v350_v4 = vld [vmem:[%s1243_s21 + $0xc0] sm:$0xff]  ;;  %v358_v5 = vpack.c.bf16 %v327_v3, %v326_v2  ;;  %v351_v6 = vld [vmem:[%s1243_s21 + $0xc8] sm:$0xff]  ;;  %v329_v12 = vld [vmem:[%s1243_s21 + $0x18] sm:$0xff]  ;;  %p1043_p12 = scmp.ne.s32.totalorder %s1041_s18, %s1042_s19  ;;  %p1047_p1 = scmp.lt.s32.totalorder %s1041_s18, %s1537_s6 }
  0x20   : > { %v370_v7 = vpack.c.bf16 %v351_v6, %v350_v4  ;;  %v342_v8 = vld [vmem:[%s1243_s21 + $0x80] sm:$0xff]  ;;  %v343_v9 = vld [vmem:[%s1243_s21 + $0x88] sm:$0xff]  ;;  %v352_v13 = vld [vmem:[%s1243_s21 + $0xd0] sm:$0xff]  ;;  %v359_v15 = vpack.c.bf16 %v329_v12, %v328_v11  ;;  %p1048_p2 = scmp.lt.s32.totalorder %s1046_s0, %s1042_s19 }
  0x21   : > { %919 = vmatmul.msk.bf16.vlgmr.msra.gmra.mxu0 %vm379_vm1, %v358_v5  ;;  %v366_v10 = vpack.c.bf16 %v343_v9, %v342_v8  ;;  %v353_v14 = vld [vmem:[%s1243_s21 + $0xd8] sm:$0xff]  ;;  %v344_v16 = vld [vmem:[%s1243_s21 + $0x90] sm:$0xff]  ;;  %v330_v20 = vld [vmem:[%s1243_s21 + $0x20] sm:$0xff]  ;;  %p1044_p13 = pnand %p1043_p12, %p1220_p4 }
  0x22   : > { %931 = vmatmul.msk.bf16.vlgmr.msra.gmra.mxu3 %vm379_vm1, %v370_v7  ;;  %v345_v17 = vld [vmem:[%s1243_s21 + $0x98] sm:$0xff]  ;;  %v371_v18 = vpack.c.bf16 %v353_v14, %v352_v13  ;;  %v331_v21 = vld [vmem:[%s1243_s21 + $0x28] sm:$0xff]  ;;  %v354_v22 = vld [vmem:[%s1243_s21 + $0xe0] sm:$0xff]  ;;  %p1049_p3 = por %p1048_p2, %p1047_p1 }
  0x23   : > { %927 = vmatmul.msk.bf16.vlgmr.msra.gmra.mxu1 %vm379_vm1, %v366_v10  ;;  %v367_v19 = vpack.c.bf16 %v345_v17, %v344_v16  ;;  %v355_v23 = vld [vmem:[%s1243_s21 + $0xe8] sm:$0xff]  ;;  %v360_v24 = vpack.c.bf16 %v331_v21, %v330_v20  ;;  %v346_v25 = vld [vmem:[%s1243_s21 + $0xa0] sm:$0xff]  ;;  %v332_v29 = vld [vmem:[%s1243_s21 + $0x30] sm:$0xff]  ;;  %p1045_p0 = pneg %p1044_p13 }
  0x24   : > { %v347_v26 = vld [vmem:[%s1243_s21 + $0xa8] sm:$0xff]  ;;  %v372_v27 = vpack.c.bf16 %v355_v23, %v354_v22  ;;  %v333_v30 = vld [vmem:[%s1243_s21 + $0x38] sm:$0xff]  ;;  %v356_v31 = vld [vmem:[%s1243_s21 + $0xf0] sm:$0xff] }
  0x25   : > { %v368_v28 = vpack.c.bf16 %v347_v26, %v346_v25  ;;  %v357_v32 = vld [vmem:[%s1243_s21 + $0xf8] sm:$0xff]  ;;  %v361_v33 = vpack.c.bf16 %v333_v30, %v332_v29  ;;  %v348_v34 = vld [vmem:[%s1243_s21 + $0xb0] sm:$0xff]  ;;  %v334_v38 = vld [vmem:[%s1243_s21 + $0x40] sm:$0xff]  ;;  %p1050_p5 = pnand %p1049_p3, %p1045_p0 }
  0x26   : > { %v349_v35 = vld [vmem:[%s1243_s21 + $0xb8] sm:$0xff]  ;;  %v373_v36 = vpack.c.bf16 %v357_v32, %v356_v31  ;;  %v335_v39 = vld [vmem:[%s1243_s21 + $0x48] sm:$0xff]  ;;  %v336_v41 = vld [vmem:[%s1243_s21 + $0x50] sm:$0xff] }
  0x27   : > { %v369_v37 = vpack.c.bf16 %v349_v35, %v348_v34  ;;  %v362_v40 = vpack.c.bf16 %v335_v39, %v334_v38  ;;  %v337_v42 = vld [vmem:[%s1243_s21 + $0x58] sm:$0xff]  ;;  %v338_v44 = vld [vmem:[%s1243_s21 + $0x60] sm:$0xff]  ;;  %v339_v45 = vld [vmem:[%s1243_s21 + $0x68] sm:$0xff] }
  0x28   : > { %v363_v43 = vpack.c.bf16 %v337_v42, %v336_v41  ;;  %v364_v46 = vpack.c.bf16 %v339_v45, %v338_v44  ;;  %v340_v47 = vld [vmem:[%s1243_s21 + $0x70] sm:$0xff]  ;;  %v341_v48 = vld [vmem:[%s1243_s21 + $0x78] sm:$0xff]  ;;  %v1316_v7 = vld [vmem:[%s1534_s3] ss:$0 sm:$0xff]  ;;  %s1418_s21 = sand.u32 1, %s1120_s25  }
  0x29   : > { %v365_v49 = vpack.c.bf16 %v341_v48, %v340_v47  ;;  %s1539_s22 = sshll.u32 %s1418_s21, 5  ;;  %s751_s17 = scalar_lea.sflag [#allocation3], %s1418_s21 }
  0x2a   : > { %s1423_s23 = scalar_lea.vmem [#allocation2], %s1539_s22 }
  0x2b   : > { %s770_s15 = sshll.u32 %s1423_s23, 4  ;;  %s771_s15 = int_to_ptr.vmem [resolvable:$true] %s770_s15 }
  0x31   : > { %920 = vmatmul.msk.bf16.gmra.mxu0 %vm379_vm1, %v359_v15 }
  0x32   : > { %932 = vmatmul.msk.bf16.gmra.mxu3 %vm379_vm1, %v371_v18 }
  0x33   : > { %928 = vmatmul.msk.bf16.gmra.mxu1 %vm379_vm1, %v367_v19 }
  0x41   : > { %921 = vmatmul.msk.bf16.gmra.mxu0 %vm379_vm1, %v360_v24 }
  0x42   : > { %933 = vmatmul.msk.bf16.gmra.mxu3 %vm379_vm1, %v372_v27 }
  0x43   : > { %929 = vmatmul.msk.bf16.gmra.mxu1 %vm379_vm1, %v368_v28 }
  0x51   : > { %922 = vmatmul.msk.bf16.gmra.mxu0 %vm379_vm1, %v361_v33 }
  0x52   : > { %934 = vmatmul.msk.bf16.gmra.mxu3 %vm379_vm1, %v373_v36 }
  0x53   : > { %930 = vmatmul.msk.bf16.gmra.mxu1 %vm379_vm1, %v369_v37 }
  0x61   : > { %923 = vmatmul.msk.bf16.gmra.mxu0 %vm379_vm1, %v362_v40 }
  0x71   : > { %924 = vmatmul.msk.bf16.gmra.mxu0 %vm379_vm1, %v363_v43 }
  0x81   : > { %925 = vmatmul.msk.bf16.gmra.mxu0 %vm379_vm1, %v364_v46 }
  0x91   : > { %926 = vmatmul.msk.bf16.gmra.mxu0 %vm379_vm1, %v365_v49 }
  0x9e   : > { %v1293_v50 = vpop.f32.mrf.mxu0 }
  0xa0   : > { %v1295_v51 = vpop.f32.mrf.mxu1 }
  0xa1   : > { %v482_v44 = vadd.f32 %v1316_v7, %v1295_v51 }
  0xa3   : > { %v537_v46 = vmax.f32 %v482_v44, 0.0 }
  0xa5   : > { %v501_v52 = vpop.f32.mrf.mxu3 }
  0xa6   : > { %v1297_v53 = vpop.f32.mrf.mxu0  ;;  %v502_v26 = vadd.f32 %v1316_v7, %v501_v52  ;;  %v554_v52 = vld [vmem:[%s1547_s1 + $0x8] sm:$0xff] }
  0xa8   : > { %v1299_v54 = vpop.f32.mrf.mxu1  ;;  %v545_v30 = vmax.f32 %v502_v26, 0.0 }
  0xa9   : > { %v484_v42 = vadd.f32 %v1316_v7, %v1299_v54 }
  0xab   : > { %v538_v45 = vmax.f32 %v484_v42, 0.0 }
  0xad   : > { %v503_v55 = vpop.f32.mrf.mxu3 }
  0xae   : > { %v1301_v56 = vpop.f32.mrf.mxu0  ;;  %v504_v24 = vadd.f32 %v1316_v7, %v503_v55 }
  0xb0   : > { %v486_v58 = vpop.f32.mrf.mxu1  ;;  %v546_v28 = vmax.f32 %v504_v24, 0.0 }
  0xb1   : > { %v487_v38 = vadd.f32 %v1316_v7, %v486_v58 }
  0xb3   : > { %v539_v43 = vmax.f32 %v487_v38, 0.0 }
  0xb5   : > { %v506_v57 = vpop.f32.mrf.mxu3 }
  0xb6   : > { %v1303_v59 = vpop.f32.mrf.mxu0  ;;  %v507_v19 = vadd.f32 %v1316_v7, %v506_v57 }
  0xb8   : > { %v488_v62 = vpop.f32.mrf.mxu1  ;;  %v547_v25 = vmax.f32 %v507_v19, 0.0 }
  0xb9   : > { %v489_v36 = vadd.f32 %v1316_v7, %v488_v62 }
  0xbb   : > { %v540_v40 = vmax.f32 %v489_v36, 0.0  ;;  %v567_v36 = vld [vmem:[%s1547_s1 + $0x70] sm:$0xff] }
  0xbd   : > { %v508_v60 = vpop.f32.mrf.mxu3 }
  0xbe   : > { %v1305_v61 = vpop.f32.mrf.mxu0  ;;  %v509_v17 = vadd.f32 %v1316_v7, %v508_v60  ;;  %v556_v60 = vld [vmem:[%s1547_s1 + $0x18] sm:$0xff] }
  0xc0   : > { %v491_v1 = vpop.f32.mrf.mxu1  ;;  %v548_v21 = vmax.f32 %v509_v17, 0.0 }
  0xc1   : > { %v492_v34 = vadd.f32 %v1316_v7, %v491_v1 }
  0xc3   : > { %v541_v39 = vmax.f32 %v492_v34, 0.0  ;;  %v563_v34 = vld [vmem:[%s1547_s1 + $0x50] sm:$0xff] }
  0xc5   : > { %v511_v63 = vpop.f32.mrf.mxu3 }
  0xc6   : > { %v1307_v0 = vpop.f32.mrf.mxu0  ;;  %v512_v14 = vadd.f32 %v1316_v7, %v511_v63 }
  0xc8   : > { %v493_v4 = vpop.f32.mrf.mxu1  ;;  %v549_v20 = vmax.f32 %v512_v14, 0.0 }
  0xc9   : > { %v494_v31 = vadd.f32 %v1316_v7, %v493_v4 }
  0xcb   : > { %v542_v37 = vmax.f32 %v494_v31, 0.0  ;;  %v957_v31 = vld [vmem:[%s1535_s4 + $0x8] sm:$0xff] }
  0xcc   : > { %711 = vmatpush.bf16.msrb.mxu3 %v957_v31 }
  0xcd   : > { %v513_v2 = vpop.f32.mrf.mxu3 }
  0xce   : > { %v1309_v3 = vpop.f32.mrf.mxu0  ;;  %v514_v11 = vadd.f32 %v1316_v7, %v513_v2 }
  0xd0   : > { %v496_v10 = vpop.f32.mrf.mxu1  ;;  %v550_v18 = vmax.f32 %v514_v11, 0.0 }
  0xd1   : > { %v497_v29 = vadd.f32 %v1316_v7, %v496_v10  ;;  %v558_v10 = vld [vmem:[%s1547_s1 + $0x28] sm:$0xff] }
  0xd3   : > { %v543_v35 = vmax.f32 %v497_v29, 0.0  ;;  %v568_v29 = vld [vmem:[%s1547_s1 + $0x78] sm:$0xff] }
  0xd5   : > { %v516_v5 = vpop.f32.mrf.mxu3 }
  0xd6   : > { %v1311_v6 = vpop.f32.mrf.mxu0  ;;  %v517_v8 = vadd.f32 %v1316_v7, %v516_v5 }
  0xd7   : > { %v459_v14 = vadd.f32 %v1316_v7, %v1311_v6  ;;  %v452_v6 = vadd.f32 %v1316_v7, %v1305_v61  ;;  %v562_v61 = vld [vmem:[%s1547_s1 + $0x48] sm:$0xff] }
  0xd8   : > { %v551_v15 = vmax.f32 %v517_v8, 0.0  ;;  %v498_v23 = vpop.f32.mrf.mxu1 }
  0xd9   : > { %v499_v27 = vadd.f32 %v1316_v7, %v498_v23  ;;  %v528_v19 = vmax.f32 %v459_v14, 0.0  ;;  %v444_v23 = vadd.f32 %v1316_v7, %v1297_v53  ;;  %v553_v53 = vld [vmem:[%s1547_s1] sm:$0xff] }
  0xdb   : > { %v544_v33 = vmax.f32 %v499_v27, 0.0  ;;  %v522_v26 = vmax.f32 %v444_v23, 0.0  ;;  %v564_v27 = vld [vmem:[%s1547_s1 + $0x58] sm:$0xff] }
  0xdd   : > { %v518_v9 = vpop.f32.mrf.mxu3 }
  0xde   : > { %v1320_v12 = vpop.f32.mrf.mxu0  ;;  %v519_v13 = vadd.f32 %v1316_v7, %v518_v9 }
  0xdf   : > { %v462_v11 = vadd.f32 %v1316_v7, %v1320_v12  ;;  %v560_v12 = vld [vmem:[%s1547_s1 + $0x38] sm:$0xff] }
  0xe0   : > { %v552_v16 = vmax.f32 %v519_v13, 0.0 }
  0xe1   : > { %v529_v17 = vmax.f32 %v462_v11, 0.0 }
  0xe2   : > { %610 = vmatpush.msra.mxu2 %v552_v16  ;;  %v457_v16 = vadd.f32 %v1316_v7, %v1309_v3 }
  0xe4   : > { %611 = vmatpush.msra.mxu2 %v551_v15 }
  0xe6   : > { %v463_v22 = vpop.f32.mrf.mxu0  ;;  %612 = vmatpush.msra.mxu2 %v550_v18  ;;  %v454_v18 = vadd.f32 %v1316_v7, %v1307_v0  ;;  %v447_v0 = vadd.f32 %v1316_v7, %v1301_v56 }
  0xe7   : > { %v464_v8 = vadd.f32 %v1316_v7, %v463_v22  ;;  %v525_v22 = vmax.f32 %v452_v6, 0.0 }
  0xe8   : > { %613 = vmatpush.msra.mxu2 %v549_v20  ;;  %v527_v20 = vmax.f32 %v457_v16, 0.0  ;;  %v526_v3 = vmax.f32 %v454_v18, 0.0 }
  0xe9   : > { %v530_v15 = vmax.f32 %v464_v8, 0.0 }
  0xea   : > { %614 = vmatpush.msra.mxu2 %v548_v21  ;;  %v449_v21 = vadd.f32 %v1316_v7, %v1303_v59  ;;  %v442_v59 = vadd.f32 %v1316_v7, %v1293_v50  ;;  %v555_v50 = vld [vmem:[%s1547_s1 + $0x10] sm:$0xff] }
  0xec   : > { %615 = vmatpush.msra.mxu2 %v547_v25  ;;  %v524_v24 = vmax.f32 %v449_v21, 0.0  ;;  %v523_v25 = vmax.f32 %v447_v0, 0.0  ;;  %v521_v56 = vmax.f32 %v442_v59, 0.0 }
  0xee   : > { %v466_v32 = vpop.f32.mrf.mxu0  ;;  %616 = vmatpush.msra.mxu2 %v546_v28  ;;  %v557_v28 = vld [vmem:[%s1547_s1 + $0x20] sm:$0xff] }
  0xef   : > { %v467_v4 = vadd.f32 %v1316_v7, %v466_v32  ;;  %v956_v32 = vld [vmem:[%s1535_s4] sm:$0xff] }
  0xf0   : > { %617 = vmatpush.msra.mxu2 %v545_v30  ;;  %v559_v30 = vld [vmem:[%s1547_s1 + $0x30] sm:$0xff]  ;;  %712 = vmatpush.bf16.msrb.mxu3 %v956_v32 }
  0xf1   : > { %v531_v13 = vmax.f32 %v467_v4, 0.0 }
  0xf2   : > { %618 = vmatpush.msra.mxu2 %v544_v33  ;;  %v561_v33 = vld [vmem:[%s1547_s1 + $0x40] sm:$0xff] }
  0xf4   : > { %619 = vmatpush.msra.mxu2 %v543_v35  ;;  %v565_v35 = vld [vmem:[%s1547_s1 + $0x60] sm:$0xff] }
  0xf6   : > { %v468_v41 = vpop.f32.mrf.mxu0  ;;  %620 = vmatpush.msra.mxu2 %v542_v37 }
  0xf7   : > { %v469_v1 = vadd.f32 %v1316_v7, %v468_v41 }
  0xf8   : > { %621 = vmatpush.msra.mxu2 %v541_v39 }
  0xf9   : > { %v532_v9 = vmax.f32 %v469_v1, 0.0 }
  0xfa   : > { %622 = vmatpush.msra.mxu2 %v540_v40 }
  0xfc   : > { %623 = vmatpush.msra.mxu2 %v539_v43 }
  0xfe   : > { %v471_v47 = vpop.f32.mrf.mxu0  ;;  %624 = vmatpush.msra.mxu2 %v538_v45 }
  0xff   : > { %v472_v62 = vadd.f32 %v1316_v7, %v471_v47 }
 0x100   : > { %625 = vmatpush.msra.mxu2 %v537_v46 }
 0x101   : > { %626 = vmatmul.f32.vlgmr.msra.gmra.mxu2 %v554_v52  ;;  %v533_v5 = vmax.f32 %v472_v62, 0.0 }
 0x106   : > { %v473_v48 = vpop.f32.mrf.mxu0 }
 0x107   : > { %v474_v51 = vadd.f32 %v1316_v7, %v473_v48 }
 0x109   : > { %v534_v2 = vmax.f32 %v474_v51, 0.0  ;;  %629 = vmatmul.f32.gmra.mxu2 %v556_v60 }
 0x10e   : > { %v476_v49 = vpop.f32.mrf.mxu0 }
 0x10f   : > { %v477_v55 = vadd.f32 %v1316_v7, %v476_v49 }
 0x111   : > { %v535_v63 = vmax.f32 %v477_v55, 0.0  ;;  %632 = vmatmul.f32.gmra.mxu2 %v558_v10 }
 0x116   : > { %v478_v54 = vpop.f32.mrf.mxu0 }
 0x117   : > { %v479_v57 = vadd.f32 %v1316_v7, %v478_v54  ;;  %v566_v7 = vld [vmem:[%s1547_s1 + $0x68] sm:$0xff] }
 0x119   : > { %v536_v58 = vmax.f32 %v479_v57, 0.0  ;;  %635 = vmatmul.f32.gmra.mxu2 %v560_v12 }
 0x11b   : > { %569 = vmatpush.msrb.mxu1 %v536_v58 }
 0x11d   : > { %570 = vmatpush.msrb.mxu1 %v535_v63 }
 0x11f   : > { %571 = vmatpush.msrb.mxu1 %v534_v2 }
 0x121   : > { %572 = vmatpush.msrb.mxu1 %v533_v5  ;;  %638 = vmatmul.f32.gmra.mxu2 %v562_v61 }
 0x123   : > { %573 = vmatpush.msrb.mxu1 %v532_v9 }
 0x125   : > { %574 = vmatpush.msrb.mxu1 %v531_v13 }
 0x127   : > { %575 = vmatpush.msrb.mxu1 %v530_v15 }
 0x129   : > { %576 = vmatpush.msrb.mxu1 %v529_v17  ;;  %641 = vmatmul.f32.gmra.mxu2 %v564_v27 }
 0x12b   : > { %577 = vmatpush.msrb.mxu1 %v528_v19 }
 0x12d   : > { %578 = vmatpush.msrb.mxu1 %v527_v20 }
 0x12f   : > { %579 = vmatpush.msrb.mxu1 %v526_v3 }
 0x131   : > { %580 = vmatpush.msrb.mxu1 %v525_v22  ;;  %644 = vmatmul.f32.gmra.mxu2 %v566_v7 }
 0x133   : > { %581 = vmatpush.msrb.mxu1 %v524_v24 }
 0x135   : > { %582 = vmatpush.msrb.mxu1 %v523_v25 }
 0x137   : > { %583 = vmatpush.msrb.mxu1 %v522_v26 }
 0x139   : > { %584 = vmatpush.msrb.mxu1 %v521_v56  ;;  %647 = vmatmul.f32.gmra.mxu2 %v568_v29 }
 0x13a   : > { %585 = vmatmul.f32.vlgmr.msrb.gmra.mxu1 %v553_v53 }
 0x142   : > { %588 = vmatmul.f32.gmra.mxu1 %v555_v50 }
 0x14a   : > { %591 = vmatmul.f32.gmra.mxu1 %v557_v28 }
 0x152   : > { %594 = vmatmul.f32.gmra.mxu1 %v559_v30 }
 0x15a   : > { %597 = vmatmul.f32.gmra.mxu1 %v561_v33 }
 0x162   : > { %600 = vmatmul.f32.gmra.mxu1 %v563_v34 }
 0x16a   : > { %603 = vmatmul.f32.gmra.mxu1 %v565_v35 }
 0x172   : > { %606 = vmatmul.f32.gmra.mxu1 %v567_v36 }
 0x184   : > { %v627_v37 = vpop.f32.mrf.mxu2 }
 0x18c   : > { %v630_v38 = vpop.f32.mrf.mxu2 }
 0x194   : > { %v633_v42 = vpop.f32.mrf.mxu2 }
 0x19c   : > { %v636_v47 = vpop.f32.mrf.mxu2 }
 0x1a4   : > { %v639_v55 = vpop.f32.mrf.mxu2 }
 0x1ac   : > { %v642_v63 = vpop.f32.mrf.mxu2 }
 0x1b4   : > { %v645_v9 = vpop.f32.mrf.mxu2 }
 0x1b7   : > { %v586_v39 = vpop.f32.mrf.mxu1 }
 0x1b8   : > { %v628_v40 = vadd.f32 %v627_v37, %v586_v39 }
 0x1ba   : > { %v651_v41 = vpack.c.bf16 %v628_v40, %v628_v40 }
 0x1bc   : > { %660 = vst.msk [vmem:[%s1423_s23] sm:$0xf] %vm659_vm2, %v651_v41  ;;  %v648_v14 = vpop.f32.mrf.mxu2 }
 0x1bf   : > { %v589_v43 = vpop.f32.mrf.mxu1 }
 0x1c0   : > { %v631_v44 = vadd.f32 %v630_v38, %v589_v43 }
 0x1c2   : > { %v652_v45 = vpack.c.bf16 %v631_v44, %v631_v44  ;;  %v668_v46 = vpack.c.bf16 %v631_v44, %v628_v40 }
 0x1c4   : > { %661 = vst.msk [vmem:[%s1423_s23 + $0x4] sm:$0xf] %vm659_vm2, %v652_v45  ;;  %943 = vmatmul.msk.bf16.vlgmr.msrb.gmra.mxu3 %vm692_vm3, %v668_v46 }
 0x1c7   : > { %v592_v48 = vpop.f32.mrf.mxu1 }
 0x1c8   : > { %v634_v49 = vadd.f32 %v633_v42, %v592_v48 }
 0x1ca   : > { %v653_v52 = vpack.c.bf16 %v634_v49, %v634_v49 }
 0x1cc   : > { %662 = vst.msk [vmem:[%s1423_s23 + $0x8] sm:$0xf] %vm659_vm2, %v653_v52 }
 0x1cf   : > { %v595_v54 = vpop.f32.mrf.mxu1 }
 0x1d0   : > { %v637_v57 = vadd.f32 %v636_v47, %v595_v54 }
 0x1d2   : > { %v654_v51 = vpack.c.bf16 %v637_v57, %v637_v57  ;;  %v669_v58 = vpack.c.bf16 %v637_v57, %v634_v49 }
 0x1d4   : > { %663 = vst.msk [vmem:[%s1423_s23 + $0xc] sm:$0xf] %vm659_vm2, %v654_v51  ;;  %944 = vmatmul.msk.bf16.gmra.mxu3 %vm692_vm3, %v669_v58 }
 0x1d7   : > { %v598_v60 = vpop.f32.mrf.mxu1 }
 0x1d8   : > { %v640_v62 = vadd.f32 %v639_v55, %v598_v60 }
 0x1da   : > { %v655_v1 = vpack.c.bf16 %v640_v62, %v640_v62 }
 0x1dc   : > { %664 = vst.msk [vmem:[%s1423_s23 + $0x10] sm:$0xf] %vm659_vm2, %v655_v1 }
 0x1df   : > { %v601_v2 = vpop.f32.mrf.mxu1 }
 0x1e0   : > { %v643_v4 = vadd.f32 %v642_v63, %v601_v2 }
 0x1e2   : > { %v656_v5 = vpack.c.bf16 %v643_v4, %v643_v4  ;;  %v670_v8 = vpack.c.bf16 %v643_v4, %v640_v62 }
 0x1e4   : > { %665 = vst.msk [vmem:[%s1423_s23 + $0x14] sm:$0xf] %vm659_vm2, %v656_v5  ;;  %945 = vmatmul.msk.bf16.gmra.mxu3 %vm692_vm3, %v670_v8 }
 0x1e7   : > { %v604_v10 = vpop.f32.mrf.mxu1 }
 0x1e8   : > { %v646_v11 = vadd.f32 %v645_v9, %v604_v10 }
 0x1ea   : > { %v657_v13 = vpack.c.bf16 %v646_v11, %v646_v11 }
 0x1ec   : > { %666 = vst.msk [vmem:[%s1423_s23 + $0x18] sm:$0xf] %vm659_vm2, %v657_v13 }
 0x1ef   : > { %v607_v15 = vpop.f32.mrf.mxu1 }
 0x1f0   : > { %v649_v16 = vadd.f32 %v648_v14, %v607_v15 }
 0x1f2   : > { %v658_v17 = vpack.c.bf16 %v649_v16, %v649_v16  ;;  %v671_v18 = vpack.c.bf16 %v649_v16, %v646_v11 }
 0x1f4   : > { %667 = vst.msk [vmem:[%s1423_s23 + $0x1c] sm:$0xf] %vm659_vm2, %v658_v17  ;;  %946 = vmatmul.msk.bf16.gmra.mxu3 %vm692_vm3, %v671_v18 }
 0x1f5   : > { %1053 = shalt.err (!%p1050_p5)
}
 0x1f6   : > { %s1138_s23 = smov 64   ;;  %s1139_s8 = smov 4   ;;  %v1025_v19 = vld [vmem:[%s1536_s5] ss:$0 sm:$0xff] }
 0x1f7   : > { %962 = dma.vmem_to_hbm [thread:$0]  (%p1220_p4), %s771_s15, 512, %s773_s16, %s751_s17, %s1138_s23, %s1138_s23, %s1139_s8  }
 0x1f8   : > { %s1548_s0 = sshll.u32 %s1418_s21, 5  ;;  %s788_s15 = scalar_lea.hbm %s1538_s7, %s958_s30 }
 0x1f9   : > { %s1471_s1 = scalar_lea.vmem [#allocation4], %s1548_s0  ;;  %s791_s17 = sshll.u32 %s788_s15, 4  ;;  %s792_s17 = int_to_ptr.hbm [resolvable:$true] %s791_s17 }
 0x1fa   : > { %s789_s16 = sshll.u32 %s1471_s1, 4  ;;  %s756_s18 = scalar_lea.sflag [#allocation5], %s1418_s21  ;;  %s790_s16 = int_to_ptr.vmem [resolvable:$true] %s789_s16 }
 0x1fb   : > { %s1068_s19 = sshra.s32 %s792_s17, 4  ;;  %s1074_s30 = scalar_lea.hbm %s1538_s7, 64  ;;  %s1069_s19 = int_to_ptr.hbm [resolvable:$true] %s1068_s19 }
 0x1fc   : > { %s1070_s20 = scalar_lea.hbm %s1069_s19, 32  ;;  %p1075_p10 = scmp.lt.s32.totalorder %s1069_s19, %s1538_s7 }
 0x1fd   : > { %p1071_p6 = scmp.ne.s32.totalorder %s1069_s19, %s1070_s20  ;;  %p1076_p11 = scmp.lt.s32.totalorder %s1074_s30, %s1070_s20 }
 0x1ff   : > { %p1072_p7 = pnand %p1071_p6, %p1220_p4  ;;  %p1077_p12 = por %p1076_p11, %p1075_p10 }
 0x201   : > { %p1073_p9 = pneg %p1072_p7 }
 0x203   : > { %p1078_p13 = pnand %p1077_p12, %p1073_p9 }
 0x247   : > { %v714_v12 = vpop.f32.mrf.mxu3 }
 0x248   : > { %v715_v6 = vadd.f32 %v1025_v19, %v714_v12 }
 0x24a   : > { %v734_v20 = vpack.c.bf16 %v715_v6, %v715_v6 }
 0x24c   : > { %742 = vst.msk [vmem:[%s1471_s1] sm:$0xf] %vm659_vm2, %v734_v20 }
 0x24f   : > { %v716_v21 = vpop.f32.mrf.mxu3 }
 0x250   : > { %v717_v3 = vadd.f32 %v1025_v19, %v716_v21 }
 0x252   : > { %v735_v0 = vpack.c.bf16 %v717_v3, %v717_v3 }
 0x254   : > { %743 = vst.msk [vmem:[%s1471_s1 + $0x4] sm:$0xf] %vm659_vm2, %v735_v0 }
 0x257   : > { %v719_v22 = vpop.f32.mrf.mxu3 }
 0x258   : > { %v720_v23 = vadd.f32 %v1025_v19, %v719_v22 }
 0x25a   : > { %v736_v24 = vpack.c.bf16 %v720_v23, %v720_v23 }
 0x25c   : > { %744 = vst.msk [vmem:[%s1471_s1 + $0x8] sm:$0xf] %vm659_vm2, %v736_v24 }
 0x25f   : > { %v721_v61 = vpop.f32.mrf.mxu3 }
 0x260   : > { %v722_v59 = vadd.f32 %v1025_v19, %v721_v61 }
 0x262   : > { %v737_v25 = vpack.c.bf16 %v722_v59, %v722_v59 }
 0x264   : > { %745 = vst.msk [vmem:[%s1471_s1 + $0xc] sm:$0xf] %vm659_vm2, %v737_v25 }
 0x267   : > { %v724_v26 = vpop.f32.mrf.mxu3 }
 0x268   : > { %v725_v56 = vadd.f32 %v1025_v19, %v724_v26 }
 0x26a   : > { %v738_v53 = vpack.c.bf16 %v725_v56, %v725_v56 }
 0x26c   : > { %746 = vst.msk [vmem:[%s1471_s1 + $0x10] sm:$0xf] %vm659_vm2, %v738_v53 }
 0x26f   : > { %v726_v27 = vpop.f32.mrf.mxu3 }
 0x270   : > { %v727_v50 = vadd.f32 %v1025_v19, %v726_v27 }
 0x272   : > { %v739_v7 = vpack.c.bf16 %v727_v50, %v727_v50 }
 0x274   : > { %747 = vst.msk [vmem:[%s1471_s1 + $0x14] sm:$0xf] %vm659_vm2, %v739_v7 }
 0x277   : > { %v729_v28 = vpop.f32.mrf.mxu3 }
 0x278   : > { %v730_v29 = vadd.f32 %v1025_v19, %v729_v28 }
 0x27a   : > { %v740_v30 = vpack.c.bf16 %v730_v29, %v730_v29 }
 0x27c   : > { %748 = vst.msk [vmem:[%s1471_s1 + $0x18] sm:$0xf] %vm659_vm2, %v740_v30 }
 0x27f   : > { %v731_v31 = vpop.f32.mrf.mxu3 }
 0x280   : > { %v732_v32 = vadd.f32 %v1025_v19, %v731_v31 }
 0x282   : > { %v741_v33 = vpack.c.bf16 %v732_v32, %v732_v32 }
 0x284   : > { %749 = vst.msk [vmem:[%s1471_s1 + $0x1c] sm:$0xf] %vm659_vm2, %v741_v33 }
 0x285   : > { %1081 = shalt.err (!%p1078_p13)
}
 0x286   : > { %963 = dma.vmem_to_hbm [thread:$0]  (%p1220_p4), %s790_s16, 512, %s792_s17, %s756_s18, %s1138_s23, %s1138_s23, %s1139_s8  }
 0x287 PF: > { %p973_p0 = scmp.ge.s32.totalorder %s1136_s29, 2  ;;  %s806_s21 = sand.u32 1, %s1116_s24  }
 0x288   : > { %s807_s1 = scalar_lea.sflag [#allocation3], %s806_s21 }
 0x289   : > { %p967_p1 = pnand %p973_p0, %p1227_p8 }
 0x28b   : > { %p968_p2 = pneg %p967_p1 }
 0x28d   : > { %1107 = dma.done.wait (%p968_p2), %s807_s1, 512  }
 0x28e   : > { %1109 = vsyncadd (%p968_p2), %s807_s1, 4294966784  ;;  %s817_s2 = scalar_lea.sflag [#allocation5], %s806_s21 }
 0x28f   : > { %1111 = dma.done.wait (%p968_p2), %s817_s2, 512  }
 0x290   : > { %1113 = vsyncadd (%p968_p2), %s817_s2, 4294966784  ;;  %s24_s29 = sadd.s32 1, %s1136_s29   ;;  %s1549_s24 = smov %s1120_s25 }
 0x291   : > { %p21_p3 = scmp.ge.s32.totalorder %s24_s29, 4   ;;  %s1550_s25 = smov %s1124_s26 }
 0x292   : > { %s1551_s26 = smov %s1233_s14  ;;  %s1552_s27 = smov %s1132_s28 }
 0x293   : > { %s1553_s28 = smov %s1555_s9  ;;  %23 = sbr.rel (!%p21_p3) target bundleno = 10 (0xa), region = 96 }
 0x298   :  { %823 = vsyncpa [#allocation3], 1 }
 0x299   :  { %825 = vsyncpa [#allocation3 + $0x1], 1 }
 0x29a   :  { %826 = vsyncpa [#allocation5], 1 }
 0x29b   :  { %828 = vsyncpa [#allocation5 + $0x1], 1 }

</bundles_post_ra>
